<compile_context>
chip_gen: v6e
topology: v6e:2x2x1
jax: 0.10.0
libtpu: 0.0.40
codegen_flags: <defaults>
</compile_context>

<pallas_src>
import jax
import jax.numpy as jnp
from jax.experimental import pallas as pl
from jax.experimental.pallas import tpu as pltpu


def _mul_kernel(scale_ref, x_ref, o_ref):
    # scale_ref: (tile_rows, 1), x_ref: (tile_rows, HW) -> broadcast multiply.
    # jnp promotion handles mixed input dtypes; cast to the output dtype.
    o_ref[...] = (x_ref[...] * scale_ref[...]).astype(o_ref.dtype)


def _pick_num_tiles(rows, out_dtype):
    """2 tiles if the split is (sublane)-legal, else 1 full-extent block."""
    sublane = 16 if jnp.dtype(out_dtype).itemsize < 4 else 8
    if rows % 2 == 0 and (rows // 2) % sublane == 0:
        return 2
    return 1


def broadcast_mul(x147, x142):
    """Elementwise x147 * x142 with (N,C,1,1) * (N,C,H,W) broadcasting."""
    assert x147.ndim == 4 and x142.ndim == 4
    n, c, h, w = x142.shape
    assert x147.shape == (n, c, 1, 1)

    out_dtype = jnp.promote_types(x147.dtype, x142.dtype)

    rows = n * c
    hw = h * w
    scale2d = x147.reshape(rows, 1)
    x2d = x142.reshape(rows, hw)

    num_tiles = _pick_num_tiles(rows, out_dtype)
    tile_rows = rows // num_tiles
    grid = (num_tiles,)

    out2d = pl.pallas_call(
        _mul_kernel,
        out_shape=jax.ShapeDtypeStruct((rows, hw), out_dtype),
        grid=grid,
        in_specs=[
            pl.BlockSpec((tile_rows, 1), lambda i: (i, 0)),
            pl.BlockSpec((tile_rows, hw), lambda i: (i, 0)),
        ],
        out_specs=pl.BlockSpec((tile_rows, hw), lambda i: (i, 0)),
        compiler_params=pltpu.CompilerParams(
            dimension_semantics=("parallel",)
        ),
    )(scale2d, x2d)

    return out2d.reshape(n, c, h, w)


if __name__ == "__main__":
    key = jax.random.PRNGKey(0)
    k1, k2 = jax.random.split(key)

    # Shapes from the module's forward: (1,672,1,1) * (1,672,14,14)
    C, H, W = 672, 14, 14
    x147 = jax.random.normal(k1, (1, C, 1, 1), dtype=jnp.float32)
    x142 = jax.random.normal(k2, (1, C, H, W), dtype=jnp.float32)

    out = broadcast_mul(x147, x142)
    out = jax.block_until_ready(out)

    # Correctness check against plain-JAX broadcasting semantics.
    ref = x147 * x142
    assert out.shape == (1, C, H, W)
    assert out.dtype == ref.dtype
    assert jnp.allclose(out, ref, atol=1e-6, rtol=1e-6)

    print("KERNEL_OK")
</pallas_src>

<mosaic_0001>
module attributes {stable_mosaic.version = 11 : i64} {
  func.func @_mul_kernel(%arg0: i32, %arg1: memref<336x1xf32, #tpu.memory_space<vmem>>, %arg2: memref<336x196xf32, #tpu.memory_space<vmem>>, %arg3: memref<336x196xf32, #tpu.memory_space<vmem>>) attributes {dimension_semantics = [#tpu.dimension_semantics<parallel>], iteration_bounds = array<i64: 2>, scalar_prefetch = 0 : i64, scratch_operands = 0 : i64, tpu.core_type = #tpu.core_type<tc>, window_params = [{transform_indices = @transform_0, window_bounds = array<i64: 336, 1>}, {transform_indices = @transform_1, window_bounds = array<i64: 336, 196>}, {transform_indices = @transform_2, window_bounds = array<i64: 336, 196>}]} {
    %c0 = arith.constant 0 : index
    %c0_0 = arith.constant 0 : index
    %0 = vector.load %arg2[%c0, %c0_0] : memref<336x196xf32, #tpu.memory_space<vmem>>, vector<336x196xf32>
    %c0_1 = arith.constant 0 : index
    %c0_2 = arith.constant 0 : index
    %1 = vector.load %arg1[%c0_1, %c0_2] : memref<336x1xf32, #tpu.memory_space<vmem>>, vector<336x1xf32>
    %2 = vector.broadcast %1 : vector<336x1xf32> to vector<336x196xf32>
    %3 = arith.mulf %0, %2 : vector<336x196xf32>
    %c0_3 = arith.constant 0 : index
    %c0_4 = arith.constant 0 : index
    %4 = vector.load %arg3[%c0_3, %c0_4] : memref<336x196xf32, #tpu.memory_space<vmem>>, vector<336x196xf32>
    tpu.vector_store %arg3[%c0_3, %c0_4], %3 {strides = array<i32>} : memref<336x196xf32, #tpu.memory_space<vmem>>, vector<336x196xf32>,
    return
  }
  func.func @transform_0(%arg0: i32) -> (i32, i32) {
    %c0_i32 = arith.constant 0 : i32
    %c0_i32_0 = arith.constant 0 : i32
    return %arg0, %c0_i32 : i32, i32
  }
  func.func @transform_1(%arg0: i32) -> (i32, i32) {
    %c0_i32 = arith.constant 0 : i32
    %c0_i32_0 = arith.constant 0 : i32
    return %arg0, %c0_i32 : i32, i32
  }
  func.func @transform_2(%arg0: i32) -> (i32, i32) {
    %c0_i32 = arith.constant 0 : i32
    %c0_i32_0 = arith.constant 0 : i32
    return %arg0, %c0_i32 : i32, i32
  }
}

</mosaic_0001>

<bundles_post_ra>
// kernel: tpu_custom_call.1
= control target key start
LH: loop header
LB: loop body
LE: loop exit
PB: predicated region body
PF: predicated region fallthrough
CT: control target
= control target key end

     0   :  { %s798_s9 = smov 0   ;;  %s1080_s0 = inlined_call_operand.vmem [shape: f32[672,1], index: 0, kind: input, shape index: {}]   ;;  %s1081_s1 = inlined_call_operand.vmem [shape: f32[672,196], index: 1, kind: input, shape index: {}]   ;;  %s1082_s2 = inlined_call_operand.vmem [shape: f32[672,196], index: 2, kind: output, shape index: {}]  }
   0x1 LB: > { %s749_s10 = sadd.s32 4294967295, %s780_s9   ;;  %p753_p0 = scmp.ge.s32.totalorder %s780_s9, 1  ;;  %s780_s9 = sphi %s798_s9, %s12_s9  }
   0x2   : > { %p125_p1 = scmp.lt.s32.totalorder %s780_s9, 3 }
   0x4   : > { %p126_p2 = pnand %p753_p0, %p125_p1 }
   0x5   : > { %s154_s11 = smul.u32 (!%p126_p2), 42, %s749_s10 }
   0x6   : > { %129 = sbr.rel (%p126_p2) target bundleno = 223 (0xdf), region = 28 }
   0x7   : > { %p155_p3 = scmp.lt.s32.totalorder (!%p126_p2), %s154_s11, 83 }
   0xb   : > { %v782_v0 = vmov 0   ;;  %s1084_s11 = smov (!%p155_p3, %s154_s11), 83  ;;  %vm595_vm0 = vcmask 556032  }
   0xc   : > { %773 = vset.pattern.permute.xlu1 %v782_v0  ;;  %772 = vset.pattern.permute.xlu0 %v782_v0  ;;  %s754_s12 = sshll.u32 %s1084_s11, 3  ;;  %s761_s16 = sshll.u32 %s1084_s11, 4 }
   0xd   : > { %s812_s15 = scalar_lea.vmem %s1080_s0, %s754_s12  ;;  %s860_s19 = scalar_lea.vmem %s1081_s1, %s761_s16 }
   0xe   : > { %v260_v1 = vld [vmem:[%s812_s15 + $0x10] sm:$0xff]  ;;  %v258_v2 = vld [vmem:[%s812_s15] sm:$0xff]  ;;  %v261_v3 = vld [vmem:[%s812_s15 + $0x18] sm:$0xff]  ;;  %s869_s22 = scalar_lea.vmem %s1082_s2, %s761_s16 }
   0xf   : > { %312 = vperm.xlu1 %773, %v260_v1   ;;  %302 = vperm.xlu0 %772, %v258_v2   ;;  %v259_v4 = vld [vmem:[%s812_s15 + $0x8] sm:$0xff]  ;;  %v262_v6 = vld [vmem:[%s812_s15 + $0x20] sm:$0xff]  ;;  %v265_v7 = vld [vmem:[%s812_s15 + $0x38] sm:$0xff] }
  0x10   : > { %v263_v5 = vld [vmem:[%s812_s15 + $0x28] sm:$0xff]  ;;  %v264_v8 = vld [vmem:[%s812_s15 + $0x30] sm:$0xff]  ;;  %v266_v10 = vld [vmem:[%s812_s15 + $0x40] sm:$0xff] }
  0x11   : > { %v267_v9 = vld [vmem:[%s812_s15 + $0x48] sm:$0xff]  ;;  %v269_v11 = vld [vmem:[%s812_s15 + $0x58] sm:$0xff]  ;;  %v268_v12 = vld [vmem:[%s812_s15 + $0x50] sm:$0xff] }
  0x12   : > { %v271_v13 = vld [vmem:[%s812_s15 + $0x68] sm:$0xff]  ;;  %v270_v14 = vld [vmem:[%s812_s15 + $0x60] sm:$0xff]  ;;  %v273_v15 = vld [vmem:[%s812_s15 + $0x78] sm:$0xff] }
  0x13   : > { %317 = vperm.xlu1 %773, %v261_v3   ;;  %307 = vperm.xlu0 %772, %v259_v4   ;;  %v272_v16 = vld [vmem:[%s812_s15 + $0x70] sm:$0xff]  ;;  %v275_v17 = vld [vmem:[%s812_s15 + $0x88] sm:$0xff]  ;;  %v274_v18 = vld [vmem:[%s812_s15 + $0x80] sm:$0xff] }
  0x14   : > { %v277_v19 = vld [vmem:[%s812_s15 + $0x98] sm:$0xff]  ;;  %v276_v20 = vld [vmem:[%s812_s15 + $0x90] sm:$0xff]  ;;  %v279_v21 = vld [vmem:[%s812_s15 + $0xa8] sm:$0xff] }
  0x15   : > { %v278_v22 = vld [vmem:[%s812_s15 + $0xa0] sm:$0xff]  ;;  %v281_v23 = vld [vmem:[%s812_s15 + $0xb8] sm:$0xff]  ;;  %v280_v24 = vld [vmem:[%s812_s15 + $0xb0] sm:$0xff] }
  0x16   : > { %v283_v25 = vld [vmem:[%s812_s15 + $0xc8] sm:$0xff]  ;;  %v282_v26 = vld [vmem:[%s812_s15 + $0xc0] sm:$0xff]  ;;  %v285_v27 = vld [vmem:[%s812_s15 + $0xd8] sm:$0xff] }
  0x17   : > { %327 = vperm.xlu1 %773, %v263_v5   ;;  %322 = vperm.xlu0 %772, %v262_v6   ;;  %v284_v28 = vld [vmem:[%s812_s15 + $0xd0] sm:$0xff]  ;;  %v287_v29 = vld [vmem:[%s812_s15 + $0xe8] sm:$0xff]  ;;  %v286_v30 = vld [vmem:[%s812_s15 + $0xe0] sm:$0xff] }
  0x18   : > { %v289_v31 = vld [vmem:[%s812_s15 + $0xf8] sm:$0xff]  ;;  %v288_v32 = vld [vmem:[%s812_s15 + $0xf0] sm:$0xff]  ;;  %v291_v33 = vld [vmem:[%s812_s15 + $0x108] sm:$0xff] }
  0x19   : > { %v290_v34 = vld [vmem:[%s812_s15 + $0x100] sm:$0xff]  ;;  %v293_v35 = vld [vmem:[%s812_s15 + $0x118] sm:$0xff]  ;;  %v292_v36 = vld [vmem:[%s812_s15 + $0x110] sm:$0xff] }
  0x1a   : > { %v295_v37 = vld [vmem:[%s812_s15 + $0x128] sm:$0xff]  ;;  %v294_v38 = vld [vmem:[%s812_s15 + $0x120] sm:$0xff]  ;;  %v297_v39 = vld [vmem:[%s812_s15 + $0x138] sm:$0xff] }
  0x1b   : > { %337 = vperm.xlu1 %773, %v265_v7   ;;  %332 = vperm.xlu0 %772, %v264_v8   ;;  %v296_v40 = vld [vmem:[%s812_s15 + $0x130] sm:$0xff]  ;;  %v299_v41 = vld [vmem:[%s812_s15 + $0x148] sm:$0xff]  ;;  %v298_v42 = vld [vmem:[%s812_s15 + $0x140] sm:$0xff] }
  0x1c   : > { %v178_v43 = vld [vmem:[%s860_s19 + $0x20] sm:$0xff]  ;;  %v179_v44 = vld [vmem:[%s860_s19 + $0x28] sm:$0xff]  ;;  %v180_v53 = vld [vmem:[%s860_s19 + $0x30] sm:$0xff] }
  0x1d   : > { %v174_v45 = vld [vmem:[%s860_s19] sm:$0xff]  ;;  %v175_v46 = vld [vmem:[%s860_s19 + $0x8] sm:$0xff]  ;;  %v181_v54 = vld [vmem:[%s860_s19 + $0x38] sm:$0xff] }
  0x1e   : > { %v176_v55 = vld [vmem:[%s860_s19 + $0x10] sm:$0xff]  ;;  %v177_v56 = vld [vmem:[%s860_s19 + $0x18] sm:$0xff]  ;;  %v182_v1 = vld [vmem:[%s860_s19 + $0x40] sm:$0xff] }
  0x1f   : > { %347 = vperm.xlu1 %773, %v267_v9   ;;  %342 = vperm.xlu0 %772, %v266_v10   ;;  %v184_v63 = vld [vmem:[%s860_s19 + $0x50] sm:$0xff]  ;;  %v185_v0 = vld [vmem:[%s860_s19 + $0x58] sm:$0xff]  ;;  %v183_v2 = vld [vmem:[%s860_s19 + $0x48] sm:$0xff] }
  0x20   : > { %v188_v9 = vld [vmem:[%s860_s19 + $0x70] sm:$0xff]  ;;  %v189_v10 = vld [vmem:[%s860_s19 + $0x78] sm:$0xff] }
  0x23   : > { %357 = vperm.xlu1 %773, %v269_v11   ;;  %352 = vperm.xlu0 %772, %v268_v12   ;;  %v186_v11 = vld [vmem:[%s860_s19 + $0x60] sm:$0xff]  ;;  %v187_v12 = vld [vmem:[%s860_s19 + $0x68] sm:$0xff] }
  0x27   : > { %367 = vperm.xlu1 %773, %v271_v13   ;;  %362 = vperm.xlu0 %772, %v270_v14  }
  0x2b   : > { %377 = vperm.xlu1 %773, %v273_v15   ;;  %372 = vperm.xlu0 %772, %v272_v16  }
  0x2f   : > { %387 = vperm.xlu1 %773, %v275_v17   ;;  %382 = vperm.xlu0 %772, %v274_v18  }
  0x33   : > { %397 = vperm.xlu1 %773, %v277_v19   ;;  %392 = vperm.xlu0 %772, %v276_v20   ;;  %v192_v19 = vld [vmem:[%s860_s19 + $0x90] sm:$0xff]  ;;  %v193_v20 = vld [vmem:[%s860_s19 + $0x98] sm:$0xff] }
  0x37   : > { %407 = vperm.xlu1 %773, %v279_v21   ;;  %402 = vperm.xlu0 %772, %v278_v22   ;;  %v190_v21 = vld [vmem:[%s860_s19 + $0x80] sm:$0xff]  ;;  %v191_v22 = vld [vmem:[%s860_s19 + $0x88] sm:$0xff] }
  0x3b   : > { %417 = vperm.xlu1 %773, %v281_v23   ;;  %412 = vperm.xlu0 %772, %v280_v24  }
  0x3f   : > { %427 = vperm.xlu1 %773, %v283_v25   ;;  %422 = vperm.xlu0 %772, %v282_v26  }
  0x43   : > { %437 = vperm.xlu1 %773, %v285_v27   ;;  %432 = vperm.xlu0 %772, %v284_v28  }
  0x47   : > { %447 = vperm.xlu1 %773, %v287_v29   ;;  %442 = vperm.xlu0 %772, %v286_v30   ;;  %v196_v29 = vld [vmem:[%s860_s19 + $0xb0] sm:$0xff]  ;;  %v197_v30 = vld [vmem:[%s860_s19 + $0xb8] sm:$0xff] }
  0x4b   : > { %457 = vperm.xlu1 %773, %v289_v31   ;;  %452 = vperm.xlu0 %772, %v288_v32   ;;  %v194_v31 = vld [vmem:[%s860_s19 + $0xa0] sm:$0xff]  ;;  %v195_v32 = vld [vmem:[%s860_s19 + $0xa8] sm:$0xff] }
  0x4f   : > { %467 = vperm.xlu1 %773, %v291_v33   ;;  %462 = vperm.xlu0 %772, %v290_v34  }
  0x53   : > { %477 = vperm.xlu1 %773, %v293_v35   ;;  %472 = vperm.xlu0 %772, %v292_v36  }
  0x57   : > { %487 = vperm.xlu1 %773, %v295_v37   ;;  %482 = vperm.xlu0 %772, %v294_v38  }
  0x5b   : > { %497 = vperm.xlu1 %773, %v297_v39   ;;  %492 = vperm.xlu0 %772, %v296_v40   ;;  %v200_v39 = vld [vmem:[%s860_s19 + $0xd0] sm:$0xff]  ;;  %v201_v40 = vld [vmem:[%s860_s19 + $0xd8] sm:$0xff] }
  0x5f   : > { %507 = vperm.xlu1 %773, %v299_v41   ;;  %502 = vperm.xlu0 %772, %v298_v42   ;;  %v198_v41 = vld [vmem:[%s860_s19 + $0xc0] sm:$0xff]  ;;  %v199_v42 = vld [vmem:[%s860_s19 + $0xc8] sm:$0xff] }
  0x8a   : > { %v313_v47 = vpop.permute.xlu1 %312  ;;  %v303_v48 = vpop.permute.xlu0 %302 }
  0x8b   : > { %v514_v49 = vmul.f32 %v313_v47, %v178_v43  ;;  %v515_v50 = vmul.f32 %v313_v47, %v179_v44  ;;  %v510_v51 = vmul.f32 %v303_v48, %v174_v45  ;;  %v511_v52 = vmul.f32 %v303_v48, %v175_v46 }
  0x8d   : > { %599 = vst [vmem:[%s869_s22 + $0x20] sm:$0xff] %v514_v49  ;;  %600 = vst.msk [vmem:[%s869_s22 + $0x28] sm:$0xff] %vm595_vm0, %v515_v50  ;;  %v204_v49 = vld [vmem:[%s860_s19 + $0xf0] sm:$0xff]  ;;  %v205_v50 = vld [vmem:[%s860_s19 + $0xf8] sm:$0xff] }
  0x8e   : > { %594 = vst [vmem:[%s869_s22] sm:$0xff] %v510_v51  ;;  %596 = vst.msk [vmem:[%s869_s22 + $0x8] sm:$0xff] %vm595_vm0, %v511_v52  ;;  %v318_v57 = vpop.permute.xlu1 %317  ;;  %v308_v58 = vpop.permute.xlu0 %307  ;;  %v202_v51 = vld [vmem:[%s860_s19 + $0xe0] sm:$0xff]  ;;  %v203_v52 = vld [vmem:[%s860_s19 + $0xe8] sm:$0xff] }
  0x8f   : > { %v516_v59 = vmul.f32 %v318_v57, %v180_v53  ;;  %v517_v60 = vmul.f32 %v318_v57, %v181_v54  ;;  %v512_v61 = vmul.f32 %v308_v58, %v176_v55  ;;  %v513_v62 = vmul.f32 %v308_v58, %v177_v56 }
  0x91   : > { %601 = vst [vmem:[%s869_s22 + $0x30] sm:$0xff] %v516_v59  ;;  %602 = vst.msk [vmem:[%s869_s22 + $0x38] sm:$0xff] %vm595_vm0, %v517_v60  ;;  %v208_v59 = vld [vmem:[%s860_s19 + $0x110] sm:$0xff]  ;;  %v209_v60 = vld [vmem:[%s860_s19 + $0x118] sm:$0xff] }
  0x92   : > { %597 = vst [vmem:[%s869_s22 + $0x10] sm:$0xff] %v512_v61  ;;  %598 = vst.msk [vmem:[%s869_s22 + $0x18] sm:$0xff] %vm595_vm0, %v513_v62  ;;  %v328_v3 = vpop.permute.xlu1 %327  ;;  %v323_v4 = vpop.permute.xlu0 %322  ;;  %v206_v61 = vld [vmem:[%s860_s19 + $0x100] sm:$0xff]  ;;  %v207_v62 = vld [vmem:[%s860_s19 + $0x108] sm:$0xff] }
  0x93   : > { %v520_v5 = vmul.f32 %v328_v3, %v184_v63  ;;  %v521_v6 = vmul.f32 %v328_v3, %v185_v0  ;;  %v518_v7 = vmul.f32 %v323_v4, %v182_v1  ;;  %v519_v8 = vmul.f32 %v323_v4, %v183_v2 }
  0x95   : > { %605 = vst [vmem:[%s869_s22 + $0x50] sm:$0xff] %v520_v5  ;;  %606 = vst.msk [vmem:[%s869_s22 + $0x58] sm:$0xff] %vm595_vm0, %v521_v6  ;;  %v212_v5 = vld [vmem:[%s860_s19 + $0x130] sm:$0xff]  ;;  %v213_v6 = vld [vmem:[%s860_s19 + $0x138] sm:$0xff] }
  0x96   : > { %603 = vst [vmem:[%s869_s22 + $0x40] sm:$0xff] %v518_v7  ;;  %604 = vst.msk [vmem:[%s869_s22 + $0x48] sm:$0xff] %vm595_vm0, %v519_v8  ;;  %v338_v13 = vpop.permute.xlu1 %337  ;;  %v333_v14 = vpop.permute.xlu0 %332  ;;  %v210_v7 = vld [vmem:[%s860_s19 + $0x120] sm:$0xff]  ;;  %v211_v8 = vld [vmem:[%s860_s19 + $0x128] sm:$0xff] }
  0x97   : > { %v524_v15 = vmul.f32 %v338_v13, %v188_v9  ;;  %v525_v16 = vmul.f32 %v338_v13, %v189_v10  ;;  %v522_v17 = vmul.f32 %v333_v14, %v186_v11  ;;  %v523_v18 = vmul.f32 %v333_v14, %v187_v12 }
  0x99   : > { %609 = vst [vmem:[%s869_s22 + $0x70] sm:$0xff] %v524_v15  ;;  %610 = vst.msk [vmem:[%s869_s22 + $0x78] sm:$0xff] %vm595_vm0, %v525_v16  ;;  %v216_v15 = vld [vmem:[%s860_s19 + $0x150] sm:$0xff]  ;;  %v217_v16 = vld [vmem:[%s860_s19 + $0x158] sm:$0xff] }
  0x9a   : > { %607 = vst [vmem:[%s869_s22 + $0x60] sm:$0xff] %v522_v17  ;;  %608 = vst.msk [vmem:[%s869_s22 + $0x68] sm:$0xff] %vm595_vm0, %v523_v18  ;;  %v348_v23 = vpop.permute.xlu1 %347  ;;  %v343_v24 = vpop.permute.xlu0 %342  ;;  %v214_v17 = vld [vmem:[%s860_s19 + $0x140] sm:$0xff]  ;;  %v215_v18 = vld [vmem:[%s860_s19 + $0x148] sm:$0xff] }
  0x9b   : > { %v528_v25 = vmul.f32 %v348_v23, %v192_v19  ;;  %v529_v26 = vmul.f32 %v348_v23, %v193_v20  ;;  %v526_v27 = vmul.f32 %v343_v24, %v190_v21  ;;  %v527_v28 = vmul.f32 %v343_v24, %v191_v22 }
  0x9d   : > { %613 = vst [vmem:[%s869_s22 + $0x90] sm:$0xff] %v528_v25  ;;  %614 = vst.msk [vmem:[%s869_s22 + $0x98] sm:$0xff] %vm595_vm0, %v529_v26  ;;  %v220_v25 = vld [vmem:[%s860_s19 + $0x170] sm:$0xff]  ;;  %v221_v26 = vld [vmem:[%s860_s19 + $0x178] sm:$0xff] }
  0x9e   : > { %611 = vst [vmem:[%s869_s22 + $0x80] sm:$0xff] %v526_v27  ;;  %612 = vst.msk [vmem:[%s869_s22 + $0x88] sm:$0xff] %vm595_vm0, %v527_v28  ;;  %v358_v33 = vpop.permute.xlu1 %357  ;;  %v353_v34 = vpop.permute.xlu0 %352  ;;  %v218_v27 = vld [vmem:[%s860_s19 + $0x160] sm:$0xff]  ;;  %v219_v28 = vld [vmem:[%s860_s19 + $0x168] sm:$0xff] }
  0x9f   : > { %v532_v35 = vmul.f32 %v358_v33, %v196_v29  ;;  %v533_v36 = vmul.f32 %v358_v33, %v197_v30  ;;  %v530_v37 = vmul.f32 %v353_v34, %v194_v31  ;;  %v531_v38 = vmul.f32 %v353_v34, %v195_v32 }
  0xa1   : > { %617 = vst [vmem:[%s869_s22 + $0xb0] sm:$0xff] %v532_v35  ;;  %618 = vst.msk [vmem:[%s869_s22 + $0xb8] sm:$0xff] %vm595_vm0, %v533_v36  ;;  %v224_v35 = vld [vmem:[%s860_s19 + $0x190] sm:$0xff]  ;;  %v225_v36 = vld [vmem:[%s860_s19 + $0x198] sm:$0xff] }
  0xa2   : > { %615 = vst [vmem:[%s869_s22 + $0xa0] sm:$0xff] %v530_v37  ;;  %616 = vst.msk [vmem:[%s869_s22 + $0xa8] sm:$0xff] %vm595_vm0, %v531_v38  ;;  %v368_v43 = vpop.permute.xlu1 %367  ;;  %v363_v44 = vpop.permute.xlu0 %362  ;;  %v222_v37 = vld [vmem:[%s860_s19 + $0x180] sm:$0xff]  ;;  %v223_v38 = vld [vmem:[%s860_s19 + $0x188] sm:$0xff] }
  0xa3   : > { %v536_v45 = vmul.f32 %v368_v43, %v200_v39  ;;  %v537_v46 = vmul.f32 %v368_v43, %v201_v40  ;;  %v534_v47 = vmul.f32 %v363_v44, %v198_v41  ;;  %v535_v48 = vmul.f32 %v363_v44, %v199_v42 }
  0xa5   : > { %621 = vst [vmem:[%s869_s22 + $0xd0] sm:$0xff] %v536_v45  ;;  %622 = vst.msk [vmem:[%s869_s22 + $0xd8] sm:$0xff] %vm595_vm0, %v537_v46  ;;  %v228_v45 = vld [vmem:[%s860_s19 + $0x1b0] sm:$0xff]  ;;  %v229_v46 = vld [vmem:[%s860_s19 + $0x1b8] sm:$0xff] }
  0xa6   : > { %619 = vst [vmem:[%s869_s22 + $0xc0] sm:$0xff] %v534_v47  ;;  %620 = vst.msk [vmem:[%s869_s22 + $0xc8] sm:$0xff] %vm595_vm0, %v535_v48  ;;  %v378_v53 = vpop.permute.xlu1 %377  ;;  %v373_v54 = vpop.permute.xlu0 %372  ;;  %v226_v47 = vld [vmem:[%s860_s19 + $0x1a0] sm:$0xff]  ;;  %v227_v48 = vld [vmem:[%s860_s19 + $0x1a8] sm:$0xff] }
  0xa7   : > { %v540_v55 = vmul.f32 %v378_v53, %v204_v49  ;;  %v541_v56 = vmul.f32 %v378_v53, %v205_v50  ;;  %v538_v57 = vmul.f32 %v373_v54, %v202_v51  ;;  %v539_v58 = vmul.f32 %v373_v54, %v203_v52 }
  0xa9   : > { %625 = vst [vmem:[%s869_s22 + $0xf0] sm:$0xff] %v540_v55  ;;  %626 = vst.msk [vmem:[%s869_s22 + $0xf8] sm:$0xff] %vm595_vm0, %v541_v56  ;;  %v232_v55 = vld [vmem:[%s860_s19 + $0x1d0] sm:$0xff]  ;;  %v233_v56 = vld [vmem:[%s860_s19 + $0x1d8] sm:$0xff] }
  0xaa   : > { %623 = vst [vmem:[%s869_s22 + $0xe0] sm:$0xff] %v538_v57  ;;  %624 = vst.msk [vmem:[%s869_s22 + $0xe8] sm:$0xff] %vm595_vm0, %v539_v58  ;;  %v388_v63 = vpop.permute.xlu1 %387  ;;  %v383_v0 = vpop.permute.xlu0 %382  ;;  %v230_v57 = vld [vmem:[%s860_s19 + $0x1c0] sm:$0xff]  ;;  %v231_v58 = vld [vmem:[%s860_s19 + $0x1c8] sm:$0xff] }
  0xab   : > { %v544_v1 = vmul.f32 %v388_v63, %v208_v59  ;;  %v545_v2 = vmul.f32 %v388_v63, %v209_v60  ;;  %v542_v3 = vmul.f32 %v383_v0, %v206_v61  ;;  %v543_v4 = vmul.f32 %v383_v0, %v207_v62 }
  0xad   : > { %629 = vst [vmem:[%s869_s22 + $0x110] sm:$0xff] %v544_v1  ;;  %630 = vst.msk [vmem:[%s869_s22 + $0x118] sm:$0xff] %vm595_vm0, %v545_v2  ;;  %v236_v1 = vld [vmem:[%s860_s19 + $0x1f0] sm:$0xff]  ;;  %v237_v2 = vld [vmem:[%s860_s19 + $0x1f8] sm:$0xff] }
  0xae   : > { %627 = vst [vmem:[%s869_s22 + $0x100] sm:$0xff] %v542_v3  ;;  %628 = vst.msk [vmem:[%s869_s22 + $0x108] sm:$0xff] %vm595_vm0, %v543_v4  ;;  %v398_v9 = vpop.permute.xlu1 %397  ;;  %v393_v10 = vpop.permute.xlu0 %392  ;;  %v234_v3 = vld [vmem:[%s860_s19 + $0x1e0] sm:$0xff]  ;;  %v235_v4 = vld [vmem:[%s860_s19 + $0x1e8] sm:$0xff] }
  0xaf   : > { %v548_v11 = vmul.f32 %v398_v9, %v212_v5  ;;  %v549_v12 = vmul.f32 %v398_v9, %v213_v6  ;;  %v546_v13 = vmul.f32 %v393_v10, %v210_v7  ;;  %v547_v14 = vmul.f32 %v393_v10, %v211_v8 }
  0xb1   : > { %633 = vst [vmem:[%s869_s22 + $0x130] sm:$0xff] %v548_v11  ;;  %634 = vst.msk [vmem:[%s869_s22 + $0x138] sm:$0xff] %vm595_vm0, %v549_v12  ;;  %v240_v11 = vld [vmem:[%s860_s19 + $0x210] sm:$0xff]  ;;  %v241_v12 = vld [vmem:[%s860_s19 + $0x218] sm:$0xff] }
  0xb2   : > { %631 = vst [vmem:[%s869_s22 + $0x120] sm:$0xff] %v546_v13  ;;  %632 = vst.msk [vmem:[%s869_s22 + $0x128] sm:$0xff] %vm595_vm0, %v547_v14  ;;  %v408_v19 = vpop.permute.xlu1 %407  ;;  %v403_v20 = vpop.permute.xlu0 %402  ;;  %v238_v13 = vld [vmem:[%s860_s19 + $0x200] sm:$0xff]  ;;  %v239_v14 = vld [vmem:[%s860_s19 + $0x208] sm:$0xff] }
  0xb3   : > { %v552_v21 = vmul.f32 %v408_v19, %v216_v15  ;;  %v553_v22 = vmul.f32 %v408_v19, %v217_v16  ;;  %v550_v23 = vmul.f32 %v403_v20, %v214_v17  ;;  %v551_v24 = vmul.f32 %v403_v20, %v215_v18 }
  0xb5   : > { %637 = vst [vmem:[%s869_s22 + $0x150] sm:$0xff] %v552_v21  ;;  %638 = vst.msk [vmem:[%s869_s22 + $0x158] sm:$0xff] %vm595_vm0, %v553_v22  ;;  %v244_v21 = vld [vmem:[%s860_s19 + $0x230] sm:$0xff]  ;;  %v245_v22 = vld [vmem:[%s860_s19 + $0x238] sm:$0xff] }
  0xb6   : > { %635 = vst [vmem:[%s869_s22 + $0x140] sm:$0xff] %v550_v23  ;;  %636 = vst.msk [vmem:[%s869_s22 + $0x148] sm:$0xff] %vm595_vm0, %v551_v24  ;;  %v418_v29 = vpop.permute.xlu1 %417  ;;  %v413_v30 = vpop.permute.xlu0 %412  ;;  %v242_v23 = vld [vmem:[%s860_s19 + $0x220] sm:$0xff]  ;;  %v243_v24 = vld [vmem:[%s860_s19 + $0x228] sm:$0xff] }
  0xb7   : > { %v556_v31 = vmul.f32 %v418_v29, %v220_v25  ;;  %v557_v32 = vmul.f32 %v418_v29, %v221_v26  ;;  %v554_v33 = vmul.f32 %v413_v30, %v218_v27  ;;  %v555_v34 = vmul.f32 %v413_v30, %v219_v28 }
  0xb9   : > { %641 = vst [vmem:[%s869_s22 + $0x170] sm:$0xff] %v556_v31  ;;  %642 = vst.msk [vmem:[%s869_s22 + $0x178] sm:$0xff] %vm595_vm0, %v557_v32  ;;  %v248_v31 = vld [vmem:[%s860_s19 + $0x250] sm:$0xff]  ;;  %v249_v32 = vld [vmem:[%s860_s19 + $0x258] sm:$0xff] }
  0xba   : > { %639 = vst [vmem:[%s869_s22 + $0x160] sm:$0xff] %v554_v33  ;;  %640 = vst.msk [vmem:[%s869_s22 + $0x168] sm:$0xff] %vm595_vm0, %v555_v34  ;;  %v428_v39 = vpop.permute.xlu1 %427  ;;  %v423_v40 = vpop.permute.xlu0 %422  ;;  %v246_v33 = vld [vmem:[%s860_s19 + $0x240] sm:$0xff]  ;;  %v247_v34 = vld [vmem:[%s860_s19 + $0x248] sm:$0xff] }
  0xbb   : > { %v560_v41 = vmul.f32 %v428_v39, %v224_v35  ;;  %v561_v42 = vmul.f32 %v428_v39, %v225_v36  ;;  %v558_v43 = vmul.f32 %v423_v40, %v222_v37  ;;  %v559_v44 = vmul.f32 %v423_v40, %v223_v38 }
  0xbd   : > { %645 = vst [vmem:[%s869_s22 + $0x190] sm:$0xff] %v560_v41  ;;  %646 = vst.msk [vmem:[%s869_s22 + $0x198] sm:$0xff] %vm595_vm0, %v561_v42  ;;  %v252_v41 = vld [vmem:[%s860_s19 + $0x270] sm:$0xff]  ;;  %v253_v42 = vld [vmem:[%s860_s19 + $0x278] sm:$0xff] }
  0xbe   : > { %643 = vst [vmem:[%s869_s22 + $0x180] sm:$0xff] %v558_v43  ;;  %644 = vst.msk [vmem:[%s869_s22 + $0x188] sm:$0xff] %vm595_vm0, %v559_v44  ;;  %v438_v49 = vpop.permute.xlu1 %437  ;;  %v433_v50 = vpop.permute.xlu0 %432  ;;  %v250_v43 = vld [vmem:[%s860_s19 + $0x260] sm:$0xff]  ;;  %v251_v44 = vld [vmem:[%s860_s19 + $0x268] sm:$0xff] }
  0xbf   : > { %v564_v51 = vmul.f32 %v438_v49, %v228_v45  ;;  %v565_v52 = vmul.f32 %v438_v49, %v229_v46  ;;  %v562_v53 = vmul.f32 %v433_v50, %v226_v47  ;;  %v563_v54 = vmul.f32 %v433_v50, %v227_v48 }
  0xc1   : > { %649 = vst [vmem:[%s869_s22 + $0x1b0] sm:$0xff] %v564_v51  ;;  %650 = vst.msk [vmem:[%s869_s22 + $0x1b8] sm:$0xff] %vm595_vm0, %v565_v52  ;;  %v256_v51 = vld [vmem:[%s860_s19 + $0x290] sm:$0xff]  ;;  %v257_v52 = vld [vmem:[%s860_s19 + $0x298] sm:$0xff] }
  0xc2   : > { %647 = vst [vmem:[%s869_s22 + $0x1a0] sm:$0xff] %v562_v53  ;;  %648 = vst.msk [vmem:[%s869_s22 + $0x1a8] sm:$0xff] %vm595_vm0, %v563_v54  ;;  %v448_v59 = vpop.permute.xlu1 %447  ;;  %v443_v60 = vpop.permute.xlu0 %442  ;;  %v254_v53 = vld [vmem:[%s860_s19 + $0x280] sm:$0xff]  ;;  %v255_v54 = vld [vmem:[%s860_s19 + $0x288] sm:$0xff] }
  0xc3   : > { %v568_v61 = vmul.f32 %v448_v59, %v232_v55  ;;  %v569_v62 = vmul.f32 %v448_v59, %v233_v56  ;;  %v566_v63 = vmul.f32 %v443_v60, %v230_v57  ;;  %v567_v0 = vmul.f32 %v443_v60, %v231_v58 }
  0xc5   : > { %653 = vst [vmem:[%s869_s22 + $0x1d0] sm:$0xff] %v568_v61  ;;  %654 = vst.msk [vmem:[%s869_s22 + $0x1d8] sm:$0xff] %vm595_vm0, %v569_v62 }
  0xc6   : > { %651 = vst [vmem:[%s869_s22 + $0x1c0] sm:$0xff] %v566_v63  ;;  %652 = vst.msk [vmem:[%s869_s22 + $0x1c8] sm:$0xff] %vm595_vm0, %v567_v0  ;;  %v458_v5 = vpop.permute.xlu1 %457  ;;  %v453_v6 = vpop.permute.xlu0 %452 }
  0xc7   : > { %v572_v7 = vmul.f32 %v458_v5, %v236_v1  ;;  %v573_v8 = vmul.f32 %v458_v5, %v237_v2  ;;  %v570_v9 = vmul.f32 %v453_v6, %v234_v3  ;;  %v571_v10 = vmul.f32 %v453_v6, %v235_v4 }
  0xc9   : > { %657 = vst [vmem:[%s869_s22 + $0x1f0] sm:$0xff] %v572_v7  ;;  %658 = vst.msk [vmem:[%s869_s22 + $0x1f8] sm:$0xff] %vm595_vm0, %v573_v8 }
  0xca   : > { %655 = vst [vmem:[%s869_s22 + $0x1e0] sm:$0xff] %v570_v9  ;;  %656 = vst.msk [vmem:[%s869_s22 + $0x1e8] sm:$0xff] %vm595_vm0, %v571_v10  ;;  %v468_v15 = vpop.permute.xlu1 %467  ;;  %v463_v16 = vpop.permute.xlu0 %462 }
  0xcb   : > { %v576_v17 = vmul.f32 %v468_v15, %v240_v11  ;;  %v577_v18 = vmul.f32 %v468_v15, %v241_v12  ;;  %v574_v19 = vmul.f32 %v463_v16, %v238_v13  ;;  %v575_v20 = vmul.f32 %v463_v16, %v239_v14 }
  0xcd   : > { %661 = vst [vmem:[%s869_s22 + $0x210] sm:$0xff] %v576_v17  ;;  %662 = vst.msk [vmem:[%s869_s22 + $0x218] sm:$0xff] %vm595_vm0, %v577_v18 }
  0xce   : > { %659 = vst [vmem:[%s869_s22 + $0x200] sm:$0xff] %v574_v19  ;;  %660 = vst.msk [vmem:[%s869_s22 + $0x208] sm:$0xff] %vm595_vm0, %v575_v20  ;;  %v478_v25 = vpop.permute.xlu1 %477  ;;  %v473_v26 = vpop.permute.xlu0 %472 }
  0xcf   : > { %v580_v27 = vmul.f32 %v478_v25, %v244_v21  ;;  %v581_v28 = vmul.f32 %v478_v25, %v245_v22  ;;  %v578_v29 = vmul.f32 %v473_v26, %v242_v23  ;;  %v579_v30 = vmul.f32 %v473_v26, %v243_v24 }
  0xd1   : > { %665 = vst [vmem:[%s869_s22 + $0x230] sm:$0xff] %v580_v27  ;;  %666 = vst.msk [vmem:[%s869_s22 + $0x238] sm:$0xff] %vm595_vm0, %v581_v28 }
  0xd2   : > { %663 = vst [vmem:[%s869_s22 + $0x220] sm:$0xff] %v578_v29  ;;  %664 = vst.msk [vmem:[%s869_s22 + $0x228] sm:$0xff] %vm595_vm0, %v579_v30  ;;  %v488_v35 = vpop.permute.xlu1 %487  ;;  %v483_v36 = vpop.permute.xlu0 %482 }
  0xd3   : > { %v584_v37 = vmul.f32 %v488_v35, %v248_v31  ;;  %v585_v38 = vmul.f32 %v488_v35, %v249_v32  ;;  %v582_v39 = vmul.f32 %v483_v36, %v246_v33  ;;  %v583_v40 = vmul.f32 %v483_v36, %v247_v34 }
  0xd5   : > { %669 = vst [vmem:[%s869_s22 + $0x250] sm:$0xff] %v584_v37  ;;  %670 = vst.msk [vmem:[%s869_s22 + $0x258] sm:$0xff] %vm595_vm0, %v585_v38 }
  0xd6   : > { %667 = vst [vmem:[%s869_s22 + $0x240] sm:$0xff] %v582_v39  ;;  %668 = vst.msk [vmem:[%s869_s22 + $0x248] sm:$0xff] %vm595_vm0, %v583_v40  ;;  %v498_v45 = vpop.permute.xlu1 %497  ;;  %v493_v46 = vpop.permute.xlu0 %492 }
  0xd7   : > { %v588_v47 = vmul.f32 %v498_v45, %v252_v41  ;;  %v589_v48 = vmul.f32 %v498_v45, %v253_v42  ;;  %v586_v49 = vmul.f32 %v493_v46, %v250_v43  ;;  %v587_v50 = vmul.f32 %v493_v46, %v251_v44 }
  0xd9   : > { %673 = vst [vmem:[%s869_s22 + $0x270] sm:$0xff] %v588_v47  ;;  %674 = vst.msk [vmem:[%s869_s22 + $0x278] sm:$0xff] %vm595_vm0, %v589_v48 }
  0xda   : > { %671 = vst [vmem:[%s869_s22 + $0x260] sm:$0xff] %v586_v49  ;;  %672 = vst.msk [vmem:[%s869_s22 + $0x268] sm:$0xff] %vm595_vm0, %v587_v50  ;;  %v508_v55 = vpop.permute.xlu1 %507  ;;  %v503_v56 = vpop.permute.xlu0 %502 }
  0xdb   : > { %v592_v57 = vmul.f32 %v508_v55, %v256_v51  ;;  %v593_v58 = vmul.f32 %v508_v55, %v257_v52  ;;  %v590_v59 = vmul.f32 %v503_v56, %v254_v53  ;;  %v591_v60 = vmul.f32 %v503_v56, %v255_v54 }
  0xdd   : > { %677 = vst [vmem:[%s869_s22 + $0x290] sm:$0xff] %v592_v57  ;;  %678 = vst.msk [vmem:[%s869_s22 + $0x298] sm:$0xff] %vm595_vm0, %v593_v58 }
  0xde   : > { %675 = vst [vmem:[%s869_s22 + $0x280] sm:$0xff] %v590_v59  ;;  %676 = vst.msk [vmem:[%s869_s22 + $0x288] sm:$0xff] %vm595_vm0, %v591_v60 }
  0xdf PF: > { %s12_s9 = sadd.s32 1, %s780_s9  }
  0xe0   : > { %p9_p4 = scmp.ge.s32.totalorder %s12_s9, 4  }
  0xe2   :  { %11 = sbr.rel (!%p9_p4) target bundleno = 1 (0x1), region = 61 }

</bundles_post_ra>
